<compile_context>
chip_gen: v5e
topology: v5e:2x2
jax: 0.10.0
libtpu: 0.0.40
codegen_flags: <defaults>
</compile_context>

<pallas_src>
import functools
import math

import jax
import jax.numpy as jnp
from jax.experimental import pallas as pl
from jax.experimental.pallas import tpu as pltpu


def _encoding_layer_kernel(xq_ref, xkv_ref, mask_ref,
                           g1_ref, wq_ref, bq_ref, wkv_ref, bkv_ref,
                           wo_ref, bo_ref,
                           g2_ref, w1_ref, b1_ref, w2_ref, b2_ref,
                           o_ref, ctx_scratch, *, num_heads, eps):
    f32 = jnp.float32
    bf16 = jnp.bfloat16

    xq = xq_ref[0].astype(f32)        # [Tq, D]  query tile (also the residual)
    xkv = xkv_ref[0].astype(f32)      # [T,  D]  full sequence (for K/V)
    Tq, D = xq.shape
    T = xkv.shape[0]
    H = num_heads
    hd = D // H
    scale = 1.0 / math.sqrt(hd)

    # Additive mask bias, computed ONCE (hoisted out of all per-head math).
    m = mask_ref[...]
    if m.ndim == 3:
        m = m[0]
    mask_bias = jnp.where(m == 0, f32(-1e9), f32(0.0))        # [Tq, T]

    # ---- RMSNorm 1 (f32 elementwise) ----
    def rms(v, g):
        return v * jax.lax.rsqrt(jnp.mean(v * v, axis=-1, keepdims=True) + eps) * g

    g1 = g1_ref[0].astype(f32)
    xnq = rms(xq, g1)
    xnkv = rms(xkv, g1)

    # ---- projections (bf16 operands, f32 accumulation on the MXU) ----
    q = jnp.dot(xnq.astype(bf16), wq_ref[...],
                preferred_element_type=f32) + bq_ref[0]        # [Tq, D]
    kv = jnp.dot(xnkv.astype(bf16), wkv_ref[...],
                 preferred_element_type=f32) + bkv_ref[0]      # [T, 2D]
    k = kv[:, :D]
    v = kv[:, D:]

    # Fold 1/sqrt(hd) into q once instead of scaling [Tq, T] scores per head.
    q = q * scale

    # Heads-leading batched layout: [H, Tq, hd] / [H, T, hd].
    qh = jnp.stack([q[:, h * hd:(h + 1) * hd] for h in range(H)], axis=0).astype(bf16)
    kh = jnp.stack([k[:, h * hd:(h + 1) * hd] for h in range(H)], axis=0).astype(bf16)
    vh = jnp.stack([v[:, h * hd:(h + 1) * hd] for h in range(H)], axis=0).astype(bf16)

    # Batched QK^T + softmax over all heads in one pass (f32 math).
    s = jnp.einsum('hqd,hkd->hqk', qh, kh,
                   preferred_element_type=f32)                 # [H, Tq, T]
    s = s + mask_bias[None, :, :]
    s = s - jnp.max(s, axis=-1, keepdims=True)
    p = jnp.exp(s)
    p = p * pl.reciprocal(jnp.sum(p, axis=-1, keepdims=True), approx=True)

    # Batched PV; head outputs land in a VMEM ctx slab (no live concatenate).
    ctx_h = jnp.einsum('hqk,hkd->hqd', p.astype(bf16), vh,
                       preferred_element_type=f32)             # [H, Tq, hd]
    for h in range(H):
        ctx_scratch[:, h * hd:(h + 1) * hd] = ctx_h[h]

    attn_out = jnp.dot(ctx_scratch[...].astype(bf16), wo_ref[...],
                       preferred_element_type=f32) + bo_ref[0]

    # residual (dropout1 == identity in eval)
    x1 = xq + attn_out

    # ---- RMSNorm 2 ----
    g2 = g2_ref[0].astype(f32)
    x2 = rms(x1, g2)

    # ---- FFN: Linear(D,4D) -> ReLU -> Linear(4D,D) ----
    hmid = jnp.dot(x2.astype(bf16), w1_ref[...],
                   preferred_element_type=f32) + b1_ref[0]
    hmid = jnp.maximum(hmid, 0.0)
    ffn_out = jnp.dot(hmid.astype(bf16), w2_ref[...],
                      preferred_element_type=f32) + b2_ref[0]

    # residual (dropout2 == identity in eval)
    o_ref[0] = (x1 + ffn_out).astype(o_ref.dtype)


def encoding_layer(x, mask, params, *, num_heads, eps=1e-6, tq=None):
    """x: [B, T, D] float32. mask: [T, T] (shared, e.g. causal) or [B, T, T];
    0 = masked out."""
    B, T, D = x.shape
    g1, w_qkv, b_qkv, w_out, b_out, g2, w1, b1, w2, b2 = params

    # Query-tile size: 256 fills the v6e/v7x MXU M-dim; fall back to full T
    # when T is small or not divisible.
    if tq is None:
        tq = 256
    if T <= tq or T % tq != 0:
        tq = T
    nq = T // tq

    bf16 = jnp.bfloat16
    # Split the fused QKV projection: Q is only needed for the query tile,
    # K/V for the full sequence.  Weights kept in bf16 (MXU operands, half
    # the VMEM/HBM footprint); biases and gains stay f32.
    wq = w_qkv[:, :D].astype(bf16)
    wkv = w_qkv[:, D:].astype(bf16)
    bq = b_qkv[:, :D]
    bkv = b_qkv[:, D:]
    wo = w_out.astype(bf16)
    w1b = w1.astype(bf16)
    w2b = w2.astype(bf16)

    if mask.ndim == 2:
        # Shared mask: one (Tq, T) tile per step, no per-batch [T,T] DMA.
        mask_spec = pl.BlockSpec((tq, T), lambda b, qi: (qi, 0))
    else:
        mask_spec = pl.BlockSpec((1, tq, T), lambda b, qi: (b, qi, 0))

    const = lambda shape: pl.BlockSpec(shape, lambda b, qi: (0,) * len(shape))

    kernel = functools.partial(_encoding_layer_kernel,
                               num_heads=num_heads, eps=eps)

    # Advisory cost estimate so XLA schedules surrounding ops sensibly.
    flops = B * nq * (20 * tq * D * D + 4 * T * D * D + 4 * tq * T * D)
    transcendentals = B * nq * (num_heads * tq * T + 2 * (tq + T))
    bytes_accessed = (B * nq * ((2 * tq * D + T * D) * 4 + tq * T * 4)
                      + 12 * D * D * 2)
    cost = pl.CostEstimate(flops=int(flops),
                           transcendentals=int(transcendentals),
                           bytes_accessed=int(bytes_accessed))

    return pl.pallas_call(
        kernel,
        out_shape=jax.ShapeDtypeStruct((B, T, D), x.dtype),
        grid_spec=pltpu.PrefetchScalarGridSpec(
            num_scalar_prefetch=0,
            grid=(B, nq),
            in_specs=[
                pl.BlockSpec((1, tq, D), lambda b, qi: (b, qi, 0)),  # x (Q tile)
                pl.BlockSpec((1, T, D), lambda b, qi: (b, 0, 0)),    # x (full, K/V)
                mask_spec,
                const((1, D)),          # norm1 gain
                const((D, D)),          # Wq   (bf16)
                const((1, D)),          # bq
                const((D, 2 * D)),      # Wkv  (bf16)
                const((1, 2 * D)),      # bkv
                const((D, D)),          # Wout (bf16)
                const((1, D)),          # bout
                const((1, D)),          # norm2 gain
                const((D, 4 * D)),      # W1   (bf16)
                const((1, 4 * D)),      # b1
                const((4 * D, D)),      # W2   (bf16)
                const((1, D)),          # b2
            ],
            out_specs=pl.BlockSpec((1, tq, D), lambda b, qi: (b, qi, 0)),
            scratch_shapes=[pltpu.VMEM((tq, D), jnp.float32)],      # ctx slab
        ),
        compiler_params=pltpu.CompilerParams(
            dimension_semantics=("parallel", "parallel"),
            vmem_limit_bytes=64 * 1024 * 1024),
        cost_estimate=cost,
    )(x, x, mask, g1, wq, bq, wkv, bkv, wo, b_out, g2, w1b, b1, w2b, b2)


def _reference(x, mask, params, *, num_heads, eps=1e-6):
    """Pure-JAX f32 reference of the pre_norm EncodingLayer forward (eval)."""
    g1, w_qkv, b_qkv, w_out, b_out, g2, w1, b1, w2, b2 = params
    B, T, D = x.shape
    hd = D // num_heads

    def rms(v, g):
        return v * jax.lax.rsqrt(jnp.mean(v * v, axis=-1, keepdims=True) + eps) * g

    xn = rms(x, g1[0])
    qkv = xn @ w_qkv + b_qkv[0]
    q, k, v = jnp.split(qkv, 3, axis=-1)
    q = q.reshape(B, T, num_heads, hd).transpose(0, 2, 1, 3)
    k = k.reshape(B, T, num_heads, hd).transpose(0, 2, 1, 3)
    v = v.reshape(B, T, num_heads, hd).transpose(0, 2, 1, 3)
    scores = jnp.einsum('bhtd,bhsd->bhts', q, k) / math.sqrt(hd)
    scores = jnp.where(mask[:, None, :, :] == 0, -1.0e9, scores)
    attn = jax.nn.softmax(scores, axis=-1)
    ctx = jnp.einsum('bhts,bhsd->bhtd', attn, v)
    ctx = ctx.transpose(0, 2, 1, 3).reshape(B, T, D)
    x1 = x + (ctx @ w_out + b_out[0])
    x2 = rms(x1, g2[0])
    h = jnp.maximum(x2 @ w1 + b1[0], 0.0)
    return x1 + (h @ w2 + b2[0])


def _init_params(key, d_model):
    """Deterministic, PyTorch-Linear-style uniform init; weights stored [in, out]."""
    ks = jax.random.split(key, 8)

    def lin(k, fan_in, fan_out):
        bound = 1.0 / math.sqrt(fan_in)
        kw, kb = jax.random.split(k)
        w = jax.random.uniform(kw, (fan_in, fan_out), jnp.float32, -bound, bound)
        b = jax.random.uniform(kb, (1, fan_out), jnp.float32, -bound, bound)
        return w, b

    g1 = jnp.ones((1, d_model), jnp.float32)
    g2 = jnp.ones((1, d_model), jnp.float32)
    w_qkv, b_qkv = lin(ks[0], d_model, 3 * d_model)
    w_out, b_out = lin(ks[1], d_model, d_model)
    w1, b1 = lin(ks[2], d_model, 4 * d_model)
    w2, b2 = lin(ks[3], 4 * d_model, d_model)
    return (g1, w_qkv, b_qkv, w_out, b_out, g2, w1, b1, w2, b2)


if __name__ == "__main__":
    B, T, D, H = 2, 8, 32, 4
    key = jax.random.PRNGKey(0)
    kx, kp = jax.random.split(key)

    x = jax.random.normal(kx, (B, T, D), jnp.float32)
    # causal mask (1 = attend, 0 = masked), shared across batch
    mask = jnp.tril(jnp.ones((T, T), jnp.int32))
    params = _init_params(kp, D)

    out = encoding_layer(x, mask, params, num_heads=H)
    out = jax.block_until_ready(out)

    ref = _reference(x, jnp.broadcast_to(mask, (B, T, T)), params, num_heads=H)
    assert out.shape == (B, T, D)
    max_diff = jnp.max(jnp.abs(out - ref))
    # bf16 MXU operands + approx reciprocal -> slightly looser tolerance vs f32 ref
    assert max_diff < 5e-2, f"max diff {max_diff}"

    print("KERNEL_OK")
</pallas_src>

<mosaic_0001>
module attributes {stable_mosaic.version = 11 : i64} {
  func.func @_encoding_layer_kernel(%arg0: i32, %arg1: i32, %arg2: memref<1x8x32xf32, #tpu.memory_space<vmem>>, %arg3: memref<1x8x32xf32, #tpu.memory_space<vmem>>, %arg4: memref<8x8xi32, #tpu.memory_space<vmem>>, %arg5: memref<1x32xf32, #tpu.memory_space<vmem>>, %arg6: memref<32x32xbf16, #tpu.memory_space<vmem>>, %arg7: memref<1x32xf32, #tpu.memory_space<vmem>>, %arg8: memref<32x64xbf16, #tpu.memory_space<vmem>>, %arg9: memref<1x64xf32, #tpu.memory_space<vmem>>, %arg10: memref<32x32xbf16, #tpu.memory_space<vmem>>, %arg11: memref<1x32xf32, #tpu.memory_space<vmem>>, %arg12: memref<1x32xf32, #tpu.memory_space<vmem>>, %arg13: memref<32x128xbf16, #tpu.memory_space<vmem>>, %arg14: memref<1x128xf32, #tpu.memory_space<vmem>>, %arg15: memref<128x32xbf16, #tpu.memory_space<vmem>>, %arg16: memref<1x32xf32, #tpu.memory_space<vmem>>, %arg17: memref<1x8x32xf32, #tpu.memory_space<vmem>>, %arg18: memref<8x32xf32, #tpu.memory_space<vmem>>) attributes {dimension_semantics = [#tpu.dimension_semantics<parallel>, #tpu.dimension_semantics<parallel>], iteration_bounds = array<i64: 2, 1>, scalar_prefetch = 0 : i64, scratch_operands = 1 : i64, tpu.core_type = #tpu.core_type<tc>, window_params = [{transform_indices = @transform_0, window_bounds = array<i64: 1, 8, 32>}, {transform_indices = @transform_1, window_bounds = array<i64: 1, 8, 32>}, {transform_indices = @transform_2, window_bounds = array<i64: 8, 8>}, {pipeline_mode = #tpu.pipeline_mode<synchronous>, transform_indices = @transform_3, window_bounds = array<i64: 1, 32>}, {pipeline_mode = #tpu.pipeline_mode<synchronous>, transform_indices = @transform_4, window_bounds = array<i64: 32, 32>}, {pipeline_mode = #tpu.pipeline_mode<synchronous>, transform_indices = @transform_5, window_bounds = array<i64: 1, 32>}, {pipeline_mode = #tpu.pipeline_mode<synchronous>, transform_indices = @transform_6, window_bounds = array<i64: 32, 64>}, {pipeline_mode = #tpu.pipeline_mode<synchronous>, transform_indices = @transform_7, window_bounds = array<i64: 1, 64>}, {pipeline_mode = #tpu.pipeline_mode<synchronous>, transform_indices = @transform_8, window_bounds = array<i64: 32, 32>}, {pipeline_mode = #tpu.pipeline_mode<synchronous>, transform_indices = @transform_9, window_bounds = array<i64: 1, 32>}, {pipeline_mode = #tpu.pipeline_mode<synchronous>, transform_indices = @transform_10, window_bounds = array<i64: 1, 32>}, {pipeline_mode = #tpu.pipeline_mode<synchronous>, transform_indices = @transform_11, window_bounds = array<i64: 32, 128>}, {pipeline_mode = #tpu.pipeline_mode<synchronous>, transform_indices = @transform_12, window_bounds = array<i64: 1, 128>}, {pipeline_mode = #tpu.pipeline_mode<synchronous>, transform_indices = @transform_13, window_bounds = array<i64: 128, 32>}, {pipeline_mode = #tpu.pipeline_mode<synchronous>, transform_indices = @transform_14, window_bounds = array<i64: 1, 32>}, {transform_indices = @transform_15, window_bounds = array<i64: 1, 8, 32>}]} {
    %c0 = arith.constant 0 : index
    %c0_0 = arith.constant 0 : index
    %c0_1 = arith.constant 0 : index
    %0 = vector.load %arg2[%c0, %c0_0, %c0_1] : memref<1x8x32xf32, #tpu.memory_space<vmem>>, vector<1x8x32xf32>
    %1 = vector.shape_cast %0 : vector<1x8x32xf32> to vector<8x32xf32>
    %c0_2 = arith.constant 0 : index
    %c0_3 = arith.constant 0 : index
    %c0_4 = arith.constant 0 : index
    %2 = vector.load %arg3[%c0_2, %c0_3, %c0_4] : memref<1x8x32xf32, #tpu.memory_space<vmem>>, vector<1x8x32xf32>
    %3 = vector.shape_cast %2 : vector<1x8x32xf32> to vector<8x32xf32>
    %c0_5 = arith.constant 0 : index
    %c0_6 = arith.constant 0 : index
    %4 = vector.load %arg4[%c0_5, %c0_6] : memref<8x8xi32, #tpu.memory_space<vmem>>, vector<8x8xi32>
    %c0_i32 = arith.constant 0 : i32
    %5 = vector.broadcast %c0_i32 : i32 to vector<8x8xi32>
    %6 = arith.cmpi eq, %4, %5 : vector<8x8xi32>
    %cst = arith.constant -1.000000e+09 : f32
    %cst_7 = arith.constant 0.000000e+00 : f32
    %7 = vector.broadcast %cst : f32 to vector<8x8xf32>
    %8 = vector.broadcast %cst_7 : f32 to vector<8x8xf32>
    %9 = arith.select %6, %7, %8 : vector<8x8xi1>, vector<8x8xf32>
    %c0_8 = arith.constant 0 : index
    %c0_9 = arith.constant 0 : index
    %10 = vector.load %arg5[%c0_8, %c0_9] : memref<1x32xf32, #tpu.memory_space<vmem>>, vector<1x32xf32>
    %11 = vector.shape_cast %10 : vector<1x32xf32> to vector<32xf32>
    %12 = arith.mulf %1, %1 : vector<8x32xf32>
    %cst_10 = arith.constant dense<0.000000e+00> : vector<8xf32>
    %13 = vector.multi_reduction <add>, %12, %cst_10 [1] : vector<8x32xf32> to vector<8xf32>
    %14 = vector.shape_cast %13 : vector<8xf32> to vector<8x1xf32>
    %cst_11 = arith.constant 3.200000e+01 : f32
    %15 = vector.broadcast %cst_11 : f32 to vector<8x1xf32>
    %16 = arith.divf %14, %15 : vector<8x1xf32>
    %cst_12 = arith.constant 9.99999997E-7 : f32
    %17 = vector.broadcast %cst_12 : f32 to vector<8x1xf32>
    %18 = arith.addf %16, %17 : vector<8x1xf32>
    %19 = math.rsqrt %18 : vector<8x1xf32>
    %20 = vector.broadcast %19 : vector<8x1xf32> to vector<8x32xf32>
    %21 = arith.mulf %1, %20 : vector<8x32xf32>
    %22 = vector.shape_cast %11 : vector<32xf32> to vector<1x32xf32>
    %23 = vector.broadcast %22 : vector<1x32xf32> to vector<8x32xf32>
    %24 = arith.mulf %21, %23 : vector<8x32xf32>
    %25 = arith.mulf %3, %3 : vector<8x32xf32>
    %cst_13 = arith.constant dense<0.000000e+00> : vector<8xf32>
    %26 = vector.multi_reduction <add>, %25, %cst_13 [1] : vector<8x32xf32> to vector<8xf32>
    %27 = vector.shape_cast %26 : vector<8xf32> to vector<8x1xf32>
    %cst_14 = arith.constant 3.200000e+01 : f32
    %28 = vector.broadcast %cst_14 : f32 to vector<8x1xf32>
    %29 = arith.divf %27, %28 : vector<8x1xf32>
    %cst_15 = arith.constant 9.99999997E-7 : f32
    %30 = vector.broadcast %cst_15 : f32 to vector<8x1xf32>
    %31 = arith.addf %29, %30 : vector<8x1xf32>
    %32 = math.rsqrt %31 : vector<8x1xf32>
    %33 = vector.broadcast %32 : vector<8x1xf32> to vector<8x32xf32>
    %34 = arith.mulf %3, %33 : vector<8x32xf32>
    %35 = vector.shape_cast %11 : vector<32xf32> to vector<1x32xf32>
    %36 = vector.broadcast %35 : vector<1x32xf32> to vector<8x32xf32>
    %37 = arith.mulf %34, %36 : vector<8x32xf32>
    %38 = arith.truncf %24 : vector<8x32xf32> to vector<8x32xbf16>
    %c0_16 = arith.constant 0 : index
    %c0_17 = arith.constant 0 : index
    %39 = vector.load %arg6[%c0_16, %c0_17] : memref<32x32xbf16, #tpu.memory_space<vmem>>, vector<32x32xbf16>
    %cst_18 = arith.constant dense<0.000000e+00> : vector<8x32xf32>
    %40 = tpu.matmul %38, %39, %cst_18 {dimension_numbers = #tpu.dot_dimension_numbers<[1], [0], [0], [1], [0, 0, 1, 1], [], []>} : vector<8x32xbf16>, vector<32x32xbf16>, vector<8x32xf32> -> vector<8x32xf32>
    %c0_19 = arith.constant 0 : index
    %c0_20 = arith.constant 0 : index
    %41 = vector.load %arg7[%c0_19, %c0_20] : memref<1x32xf32, #tpu.memory_space<vmem>>, vector<1x32xf32>
    %42 = vector.shape_cast %41 : vector<1x32xf32> to vector<32xf32>
    %43 = vector.shape_cast %42 : vector<32xf32> to vector<1x32xf32>
    %44 = vector.broadcast %43 : vector<1x32xf32> to vector<8x32xf32>
    %45 = arith.addf %40, %44 : vector<8x32xf32>
    %46 = arith.truncf %37 : vector<8x32xf32> to vector<8x32xbf16>
    %c0_21 = arith.constant 0 : index
    %c0_22 = arith.constant 0 : index
    %47 = vector.load %arg8[%c0_21, %c0_22] : memref<32x64xbf16, #tpu.memory_space<vmem>>, vector<32x64xbf16>
    %cst_23 = arith.constant dense<0.000000e+00> : vector<8x64xf32>
    %48 = tpu.matmul %46, %47, %cst_23 {dimension_numbers = #tpu.dot_dimension_numbers<[1], [0], [0], [1], [0, 0, 1, 1], [], []>} : vector<8x32xbf16>, vector<32x64xbf16>, vector<8x64xf32> -> vector<8x64xf32>
    %c0_24 = arith.constant 0 : index
    %c0_25 = arith.constant 0 : index
    %49 = vector.load %arg9[%c0_24, %c0_25] : memref<1x64xf32, #tpu.memory_space<vmem>>, vector<1x64xf32>
    %50 = vector.shape_cast %49 : vector<1x64xf32> to vector<64xf32>
    %51 = vector.shape_cast %50 : vector<64xf32> to vector<1x64xf32>
    %52 = vector.broadcast %51 : vector<1x64xf32> to vector<8x64xf32>
    %53 = arith.addf %48, %52 : vector<8x64xf32>
    %54 = vector.extract_strided_slice %53 {offsets = [0, 0], sizes = [8, 32], strides = [1, 1]} : vector<8x64xf32> to vector<8x32xf32>
    %55 = vector.extract_strided_slice %53 {offsets = [0, 32], sizes = [8, 32], strides = [1, 1]} : vector<8x64xf32> to vector<8x32xf32>
    %cst_26 = arith.constant 0.353553385 : f32
    %56 = vector.broadcast %cst_26 : f32 to vector<8x32xf32>
    %57 = arith.mulf %45, %56 : vector<8x32xf32>
    %58 = vector.extract_strided_slice %57 {offsets = [0, 0], sizes = [8, 8], strides = [1, 1]} : vector<8x32xf32> to vector<8x8xf32>
    %59 = vector.extract_strided_slice %57 {offsets = [0, 8], sizes = [8, 8], strides = [1, 1]} : vector<8x32xf32> to vector<8x8xf32>
    %60 = vector.extract_strided_slice %57 {offsets = [0, 16], sizes = [8, 8], strides = [1, 1]} : vector<8x32xf32> to vector<8x8xf32>
    %61 = vector.extract_strided_slice %57 {offsets = [0, 24], sizes = [8, 8], strides = [1, 1]} : vector<8x32xf32> to vector<8x8xf32>
    %62 = vector.shape_cast %58 : vector<8x8xf32> to vector<1x8x8xf32>
    %63 = vector.shape_cast %59 : vector<8x8xf32> to vector<1x8x8xf32>
    %64 = vector.shape_cast %60 : vector<8x8xf32> to vector<1x8x8xf32>
    %65 = vector.shape_cast %61 : vector<8x8xf32> to vector<1x8x8xf32>
    %66 = tpu.concatenate %62, %63, %64, %65 in 0 : vector<1x8x8xf32>, vector<1x8x8xf32>, vector<1x8x8xf32>, vector<1x8x8xf32> -> vector<4x8x8xf32>
    %67 = arith.truncf %66 : vector<4x8x8xf32> to vector<4x8x8xbf16>
    %68 = vector.extract_strided_slice %54 {offsets = [0, 0], sizes = [8, 8], strides = [1, 1]} : vector<8x32xf32> to vector<8x8xf32>
    %69 = vector.extract_strided_slice %54 {offsets = [0, 8], sizes = [8, 8], strides = [1, 1]} : vector<8x32xf32> to vector<8x8xf32>
    %70 = vector.extract_strided_slice %54 {offsets = [0, 16], sizes = [8, 8], strides = [1, 1]} : vector<8x32xf32> to vector<8x8xf32>
    %71 = vector.extract_strided_slice %54 {offsets = [0, 24], sizes = [8, 8], strides = [1, 1]} : vector<8x32xf32> to vector<8x8xf32>
    %72 = vector.shape_cast %68 : vector<8x8xf32> to vector<1x8x8xf32>
    %73 = vector.shape_cast %69 : vector<8x8xf32> to vector<1x8x8xf32>
    %74 = vector.shape_cast %70 : vector<8x8xf32> to vector<1x8x8xf32>
    %75 = vector.shape_cast %71 : vector<8x8xf32> to vector<1x8x8xf32>
    %76 = tpu.concatenate %72, %73, %74, %75 in 0 : vector<1x8x8xf32>, vector<1x8x8xf32>, vector<1x8x8xf32>, vector<1x8x8xf32> -> vector<4x8x8xf32>
    %77 = arith.truncf %76 : vector<4x8x8xf32> to vector<4x8x8xbf16>
    %78 = vector.extract_strided_slice %55 {offsets = [0, 0], sizes = [8, 8], strides = [1, 1]} : vector<8x32xf32> to vector<8x8xf32>
    %79 = vector.extract_strided_slice %55 {offsets = [0, 8], sizes = [8, 8], strides = [1, 1]} : vector<8x32xf32> to vector<8x8xf32>
    %80 = vector.extract_strided_slice %55 {offsets = [0, 16], sizes = [8, 8], strides = [1, 1]} : vector<8x32xf32> to vector<8x8xf32>
    %81 = vector.extract_strided_slice %55 {offsets = [0, 24], sizes = [8, 8], strides = [1, 1]} : vector<8x32xf32> to vector<8x8xf32>
    %82 = vector.shape_cast %78 : vector<8x8xf32> to vector<1x8x8xf32>
    %83 = vector.shape_cast %79 : vector<8x8xf32> to vector<1x8x8xf32>
    %84 = vector.shape_cast %80 : vector<8x8xf32> to vector<1x8x8xf32>
    %85 = vector.shape_cast %81 : vector<8x8xf32> to vector<1x8x8xf32>
    %86 = tpu.concatenate %82, %83, %84, %85 in 0 : vector<1x8x8xf32>, vector<1x8x8xf32>, vector<1x8x8xf32>, vector<1x8x8xf32> -> vector<4x8x8xf32>
    %87 = arith.truncf %86 : vector<4x8x8xf32> to vector<4x8x8xbf16>
    "tpu.trace_start"() <{level = 10 : i32, message = "hqd,hkd->hqk"}> : () -> ()
    %cst_27 = arith.constant dense<0.000000e+00> : vector<4x8x8xf32>
    %88 = tpu.matmul %67, %77, %cst_27 {dimension_numbers = #tpu.dot_dimension_numbers<[2], [2], [1], [1], [0, 0, 0, 1, 1, 1], [0], [0]>} : vector<4x8x8xbf16>, vector<4x8x8xbf16>, vector<4x8x8xf32> -> vector<4x8x8xf32>
    "tpu.trace_stop"() : () -> ()
    %89 = vector.shape_cast %9 : vector<8x8xf32> to vector<1x8x8xf32>
    %90 = vector.broadcast %89 : vector<1x8x8xf32> to vector<4x8x8xf32>
    %91 = arith.addf %88, %90 : vector<4x8x8xf32>
    %cst_28 = arith.constant dense<0xFF800000> : vector<4x8xf32>
    %92 = vector.multi_reduction <maximumf>, %91, %cst_28 [2] : vector<4x8x8xf32> to vector<4x8xf32>
    %93 = vector.shape_cast %92 : vector<4x8xf32> to vector<4x8x1xf32>
    %94 = vector.broadcast %93 : vector<4x8x1xf32> to vector<4x8x8xf32>
    %95 = arith.subf %91, %94 : vector<4x8x8xf32>
    %96 = math.exp %95 : vector<4x8x8xf32>
    %cst_29 = arith.constant dense<0.000000e+00> : vector<4x8xf32>
    %97 = vector.multi_reduction <add>, %96, %cst_29 [2] : vector<4x8x8xf32> to vector<4x8xf32>
    %98 = vector.shape_cast %97 : vector<4x8xf32> to vector<4x8x1xf32>
    %99 = tpu.reciprocal %98 {approx = true} : vector<4x8x1xf32> -> vector<4x8x1xf32>
    %100 = vector.broadcast %99 : vector<4x8x1xf32> to vector<4x8x8xf32>
    %101 = arith.mulf %96, %100 : vector<4x8x8xf32>
    %102 = arith.truncf %101 : vector<4x8x8xf32> to vector<4x8x8xbf16>
    "tpu.trace_start"() <{level = 10 : i32, message = "hqk,hkd->hqd"}> : () -> ()
    %cst_30 = arith.constant dense<0.000000e+00> : vector<4x8x8xf32>
    %103 = tpu.matmul %102, %87, %cst_30 {dimension_numbers = #tpu.dot_dimension_numbers<[2], [1], [1], [2], [0, 0, 0, 1, 1, 2], [0], [0]>} : vector<4x8x8xbf16>, vector<4x8x8xbf16>, vector<4x8x8xf32> -> vector<4x8x8xf32>
    "tpu.trace_stop"() : () -> ()
    %104 = vector.extract_strided_slice %103 {offsets = [0, 0, 0], sizes = [1, 8, 8], strides = [1, 1, 1]} : vector<4x8x8xf32> to vector<1x8x8xf32>
    %105 = vector.shape_cast %104 : vector<1x8x8xf32> to vector<8x8xf32>
    %c0_31 = arith.constant 0 : index
    %c0_32 = arith.constant 0 : index
    %106 = vector.load %arg18[%c0_31, %c0_32] : memref<8x32xf32, #tpu.memory_space<vmem>>, vector<8x8xf32>
    tpu.vector_store %arg18[%c0_31, %c0_32], %105 {strides = array<i32>} : memref<8x32xf32, #tpu.memory_space<vmem>>, vector<8x8xf32>,
    %107 = vector.extract_strided_slice %103 {offsets = [1, 0, 0], sizes = [1, 8, 8], strides = [1, 1, 1]} : vector<4x8x8xf32> to vector<1x8x8xf32>
    %108 = vector.shape_cast %107 : vector<1x8x8xf32> to vector<8x8xf32>
    %c0_33 = arith.constant 0 : index
    %c8 = arith.constant 8 : index
    %109 = vector.load %arg18[%c0_33, %c8] : memref<8x32xf32, #tpu.memory_space<vmem>>, vector<8x8xf32>
    tpu.vector_store %arg18[%c0_33, %c8], %108 {strides = array<i32>} : memref<8x32xf32, #tpu.memory_space<vmem>>, vector<8x8xf32>,
    %110 = vector.extract_strided_slice %103 {offsets = [2, 0, 0], sizes = [1, 8, 8], strides = [1, 1, 1]} : vector<4x8x8xf32> to vector<1x8x8xf32>
    %111 = vector.shape_cast %110 : vector<1x8x8xf32> to vector<8x8xf32>
    %c0_34 = arith.constant 0 : index
    %c16 = arith.constant 16 : index
    %112 = vector.load %arg18[%c0_34, %c16] : memref<8x32xf32, #tpu.memory_space<vmem>>, vector<8x8xf32>
    tpu.vector_store %arg18[%c0_34, %c16], %111 {strides = array<i32>} : memref<8x32xf32, #tpu.memory_space<vmem>>, vector<8x8xf32>,
    %113 = vector.extract_strided_slice %103 {offsets = [3, 0, 0], sizes = [1, 8, 8], strides = [1, 1, 1]} : vector<4x8x8xf32> to vector<1x8x8xf32>
    %114 = vector.shape_cast %113 : vector<1x8x8xf32> to vector<8x8xf32>
    %c0_35 = arith.constant 0 : index
    %c24 = arith.constant 24 : index
    %115 = vector.load %arg18[%c0_35, %c24] : memref<8x32xf32, #tpu.memory_space<vmem>>, vector<8x8xf32>
    tpu.vector_store %arg18[%c0_35, %c24], %114 {strides = array<i32>} : memref<8x32xf32, #tpu.memory_space<vmem>>, vector<8x8xf32>,
    %c0_36 = arith.constant 0 : index
    %c0_37 = arith.constant 0 : index
    %116 = vector.load %arg18[%c0_36, %c0_37] : memref<8x32xf32, #tpu.memory_space<vmem>>, vector<8x32xf32>
    %117 = arith.truncf %116 : vector<8x32xf32> to vector<8x32xbf16>
    %c0_38 = arith.constant 0 : index
    %c0_39 = arith.constant 0 : index
    %118 = vector.load %arg10[%c0_38, %c0_39] : memref<32x32xbf16, #tpu.memory_space<vmem>>, vector<32x32xbf16>
    %cst_40 = arith.constant dense<0.000000e+00> : vector<8x32xf32>
    %119 = tpu.matmul %117, %118, %cst_40 {dimension_numbers = #tpu.dot_dimension_numbers<[1], [0], [0], [1], [0, 0, 1, 1], [], []>} : vector<8x32xbf16>, vector<32x32xbf16>, vector<8x32xf32> -> vector<8x32xf32>
    %c0_41 = arith.constant 0 : index
    %c0_42 = arith.constant 0 : index
    %120 = vector.load %arg11[%c0_41, %c0_42] : memref<1x32xf32, #tpu.memory_space<vmem>>, vector<1x32xf32>
    %121 = vector.shape_cast %120 : vector<1x32xf32> to vector<32xf32>
    %122 = vector.shape_cast %121 : vector<32xf32> to vector<1x32xf32>
    %123 = vector.broadcast %122 : vector<1x32xf32> to vector<8x32xf32>
    %124 = arith.addf %119, %123 : vector<8x32xf32>
    %125 = arith.addf %1, %124 : vector<8x32xf32>
    %c0_43 = arith.constant 0 : index
    %c0_44 = arith.constant 0 : index
    %126 = vector.load %arg12[%c0_43, %c0_44] : memref<1x32xf32, #tpu.memory_space<vmem>>, vector<1x32xf32>
    %127 = vector.shape_cast %126 : vector<1x32xf32> to vector<32xf32>
    %128 = arith.mulf %125, %125 : vector<8x32xf32>
    %cst_45 = arith.constant dense<0.000000e+00> : vector<8xf32>
    %129 = vector.multi_reduction <add>, %128, %cst_45 [1] : vector<8x32xf32> to vector<8xf32>
    %130 = vector.shape_cast %129 : vector<8xf32> to vector<8x1xf32>
    %cst_46 = arith.constant 3.200000e+01 : f32
    %131 = vector.broadcast %cst_46 : f32 to vector<8x1xf32>
    %132 = arith.divf %130, %131 : vector<8x1xf32>
    %cst_47 = arith.constant 9.99999997E-7 : f32
    %133 = vector.broadcast %cst_47 : f32 to vector<8x1xf32>
    %134 = arith.addf %132, %133 : vector<8x1xf32>
    %135 = math.rsqrt %134 : vector<8x1xf32>
    %136 = vector.broadcast %135 : vector<8x1xf32> to vector<8x32xf32>
    %137 = arith.mulf %125, %136 : vector<8x32xf32>
    %138 = vector.shape_cast %127 : vector<32xf32> to vector<1x32xf32>
    %139 = vector.broadcast %138 : vector<1x32xf32> to vector<8x32xf32>
    %140 = arith.mulf %137, %139 : vector<8x32xf32>
    %141 = arith.truncf %140 : vector<8x32xf32> to vector<8x32xbf16>
    %c0_48 = arith.constant 0 : index
    %c0_49 = arith.constant 0 : index
    %142 = vector.load %arg13[%c0_48, %c0_49] : memref<32x128xbf16, #tpu.memory_space<vmem>>, vector<32x128xbf16>
    %cst_50 = arith.constant dense<0.000000e+00> : vector<8x128xf32>
    %143 = tpu.matmul %141, %142, %cst_50 {dimension_numbers = #tpu.dot_dimension_numbers<[1], [0], [0], [1], [0, 0, 1, 1], [], []>} : vector<8x32xbf16>, vector<32x128xbf16>, vector<8x128xf32> -> vector<8x128xf32>
    %c0_51 = arith.constant 0 : index
    %c0_52 = arith.constant 0 : index
    %144 = vector.load %arg14[%c0_51, %c0_52] : memref<1x128xf32, #tpu.memory_space<vmem>>, vector<1x128xf32>
    %145 = vector.shape_cast %144 : vector<1x128xf32> to vector<128xf32>
    %146 = vector.shape_cast %145 : vector<128xf32> to vector<1x128xf32>
    %147 = vector.broadcast %146 : vector<1x128xf32> to vector<8x128xf32>
    %148 = arith.addf %143, %147 : vector<8x128xf32>
    %cst_53 = arith.constant 0.000000e+00 : f32
    %149 = vector.broadcast %cst_53 : f32 to vector<8x128xf32>
    %150 = arith.maximumf %148, %149 : vector<8x128xf32>
    %151 = arith.truncf %150 : vector<8x128xf32> to vector<8x128xbf16>
    %c0_54 = arith.constant 0 : index
    %c0_55 = arith.constant 0 : index
    %152 = vector.load %arg15[%c0_54, %c0_55] : memref<128x32xbf16, #tpu.memory_space<vmem>>, vector<128x32xbf16>
    %cst_56 = arith.constant dense<0.000000e+00> : vector<8x32xf32>
    %153 = tpu.matmul %151, %152, %cst_56 {dimension_numbers = #tpu.dot_dimension_numbers<[1], [0], [0], [1], [0, 0, 1, 1], [], []>} : vector<8x128xbf16>, vector<128x32xbf16>, vector<8x32xf32> -> vector<8x32xf32>
    %c0_57 = arith.constant 0 : index
    %c0_58 = arith.constant 0 : index
    %154 = vector.load %arg16[%c0_57, %c0_58] : memref<1x32xf32, #tpu.memory_space<vmem>>, vector<1x32xf32>
    %155 = vector.shape_cast %154 : vector<1x32xf32> to vector<32xf32>
    %156 = vector.shape_cast %155 : vector<32xf32> to vector<1x32xf32>
    %157 = vector.broadcast %156 : vector<1x32xf32> to vector<8x32xf32>
    %158 = arith.addf %153, %157 : vector<8x32xf32>
    %159 = arith.addf %125, %158 : vector<8x32xf32>
    %c0_59 = arith.constant 0 : index
    %c0_60 = arith.constant 0 : index
    %c0_61 = arith.constant 0 : index
    %160 = vector.load %arg17[%c0_59, %c0_60, %c0_61] : memref<1x8x32xf32, #tpu.memory_space<vmem>>, vector<1x8x32xf32>
    %161 = vector.shape_cast %160 : vector<1x8x32xf32> to vector<8x32xf32>
    %162 = vector.shape_cast %159 : vector<8x32xf32> to vector<1x8x32xf32>
    tpu.vector_store %arg17[%c0_59, %c0_60, %c0_61], %162 {strides = array<i32>} : memref<1x8x32xf32, #tpu.memory_space<vmem>>, vector<1x8x32xf32>,
    return
  }
  func.func @transform_0(%arg0: i32, %arg1: i32) -> (i32, i32, i32) {
    %c0_i32 = arith.constant 0 : i32
    %c0_i32_0 = arith.constant 0 : i32
    return %arg0, %arg1, %c0_i32 : i32, i32, i32
  }
  func.func @transform_1(%arg0: i32, %arg1: i32) -> (i32, i32, i32) {
    %c0_i32 = arith.constant 0 : i32
    %c0_i32_0 = arith.constant 0 : i32
    %c0_i32_1 = arith.constant 0 : i32
    return %arg0, %c0_i32, %c0_i32_0 : i32, i32, i32
  }
  func.func @transform_2(%arg0: i32, %arg1: i32) -> (i32, i32) {
    %c0_i32 = arith.constant 0 : i32
    %c0_i32_0 = arith.constant 0 : i32
    return %arg1, %c0_i32 : i32, i32
  }
  func.func @transform_3(%arg0: i32, %arg1: i32) -> (i32, i32) {
    %c0_i32 = arith.constant 0 : i32
    %c0_i32_0 = arith.constant 0 : i32
    %c0_i32_1 = arith.constant 0 : i32
    return %c0_i32, %c0_i32_0 : i32, i32
  }
  func.func @transform_4(%arg0: i32, %arg1: i32) -> (i32, i32) {
    %c0_i32 = arith.constant 0 : i32
    %c0_i32_0 = arith.constant 0 : i32
    %c0_i32_1 = arith.constant 0 : i32
    return %c0_i32, %c0_i32_0 : i32, i32
  }
  func.func @transform_5(%arg0: i32, %arg1: i32) -> (i32, i32) {
    %c0_i32 = arith.constant 0 : i32
    %c0_i32_0 = arith.constant 0 : i32
    %c0_i32_1 = arith.constant 0 : i32
    return %c0_i32, %c0_i32_0 : i32, i32
  }
  func.func @transform_6(%arg0: i32, %arg1: i32) -> (i32, i32) {
    %c0_i32 = arith.constant 0 : i32
    %c0_i32_0 = arith.constant 0 : i32
    %c0_i32_1 = arith.constant 0 : i32
    return %c0_i32, %c0_i32_0 : i32, i32
  }
  func.func @transform_7(%arg0: i32, %arg1: i32) -> (i32, i32) {
    %c0_i32 = arith.constant 0 : i32
    %c0_i32_0 = arith.constant 0 : i32
    %c0_i32_1 = arith.constant 0 : i32
    return %c0_i32, %c0_i32_0 : i32, i32
  }
  func.func @transform_8(%arg0: i32, %arg1: i32) -> (i32, i32) {
    %c0_i32 = arith.constant 0 : i32
    %c0_i32_0 = arith.constant 0 : i32
    %c0_i32_1 = arith.constant 0 : i32
    return %c0_i32, %c0_i32_0 : i32, i32
  }
  func.func @transform_9(%arg0: i32, %arg1: i32) -> (i32, i32) {
    %c0_i32 = arith.constant 0 : i32
    %c0_i32_0 = arith.constant 0 : i32
    %c0_i32_1 = arith.constant 0 : i32
    return %c0_i32, %c0_i32_0 : i32, i32
  }
  func.func @transform_10(%arg0: i32, %arg1: i32) -> (i32, i32) {
    %c0_i32 = arith.constant 0 : i32
    %c0_i32_0 = arith.constant 0 : i32
    %c0_i32_1 = arith.constant 0 : i32
    return %c0_i32, %c0_i32_0 : i32, i32
  }
  func.func @transform_11(%arg0: i32, %arg1: i32) -> (i32, i32) {
    %c0_i32 = arith.constant 0 : i32
    %c0_i32_0 = arith.constant 0 : i32
    %c0_i32_1 = arith.constant 0 : i32
    return %c0_i32, %c0_i32_0 : i32, i32
  }
  func.func @transform_12(%arg0: i32, %arg1: i32) -> (i32, i32) {
    %c0_i32 = arith.constant 0 : i32
    %c0_i32_0 = arith.constant 0 : i32
    %c0_i32_1 = arith.constant 0 : i32
    return %c0_i32, %c0_i32_0 : i32, i32
  }
  func.func @transform_13(%arg0: i32, %arg1: i32) -> (i32, i32) {
    %c0_i32 = arith.constant 0 : i32
    %c0_i32_0 = arith.constant 0 : i32
    %c0_i32_1 = arith.constant 0 : i32
    return %c0_i32, %c0_i32_0 : i32, i32
  }
  func.func @transform_14(%arg0: i32, %arg1: i32) -> (i32, i32) {
    %c0_i32 = arith.constant 0 : i32
    %c0_i32_0 = arith.constant 0 : i32
    %c0_i32_1 = arith.constant 0 : i32
    return %c0_i32, %c0_i32_0 : i32, i32
  }
  func.func @transform_15(%arg0: i32, %arg1: i32) -> (i32, i32, i32) {
    %c0_i32 = arith.constant 0 : i32
    %c0_i32_0 = arith.constant 0 : i32
    return %arg0, %arg1, %c0_i32 : i32, i32, i32
  }
}

</mosaic_0001>

<bundles_post_ra>
// kernel: tpu_custom_call.1
= control target key start
LH: loop header
LB: loop body
LE: loop exit
PB: predicated region body
PF: predicated region fallthrough
CT: control target
= control target key end

     0   :  { %s1990_s0 = inlined_call_operand.vmem [shape: f32[2,8,32], index: 0, kind: input, shape index: {}]   ;;  %s1991_s1 = inlined_call_operand.vmem [shape: f32[2,8,32], index: 1, kind: input, shape index: {}]   ;;  %s1992_s2 = inlined_call_operand.hbm [shape: s32[8,8], index: 2, kind: input, shape index: {}]   ;;  %s1993_s3 = inlined_call_operand.vmem [shape: f32[1,32], index: 3, kind: input, shape index: {}]   ;;  %s1994_s4 = inlined_call_operand.vmem [shape: bf16[32,32], index: 4, kind: input, shape index: {}]   ;;  %s1995_s5 = inlined_call_operand.vmem [shape: f32[1,32], index: 5, kind: input, shape index: {}]   ;;  %s1996_s6 = inlined_call_operand.vmem [shape: bf16[32,64], index: 6, kind: input, shape index: {}]   ;;  %s1997_s7 = inlined_call_operand.vmem [shape: f32[1,64], index: 7, kind: input, shape index: {}]   ;;  %s1998_s8 = inlined_call_operand.vmem [shape: bf16[32,32], index: 8, kind: input, shape index: {}]   ;;  %s1999_s9 = inlined_call_operand.vmem [shape: f32[1,32], index: 9, kind: input, shape index: {}]   ;;  %s2000_s10 = inlined_call_operand.vmem [shape: f32[1,32], index: 10, kind: input, shape index: {}]   ;;  %s2001_s11 = inlined_call_operand.hbm [shape: bf16[32,128], index: 11, kind: input, shape index: {}]   ;;  %s2002_s12 = inlined_call_operand.vmem [shape: f32[1,128], index: 12, kind: input, shape index: {}]   ;;  %s2003_s13 = inlined_call_operand.vmem [shape: bf16[128,32], index: 13, kind: input, shape index: {}]   ;;  %s2004_s14 = inlined_call_operand.vmem [shape: f32[1,32], index: 14, kind: input, shape index: {}]   ;;  %s2005_s15 = inlined_call_operand.hbm [shape: f32[2,8,32], index: 15, kind: output, shape index: {}]  }
   0x1   :  { %2013 = sst [smem:[#allocation19_spill]] %s1990_s0 }
   0x2   :  { %20 = vsyncpa [#allocation4], 0 }
   0x3   :  { %21 = vsyncpa [#allocation7], 0 }
   0x4   :  { %22 = vsyncpa [#allocation5], 0 }
   0x5   :  { %24 = vsyncpa [#allocation5 + $0x1], 0  ;;  %s1743_s18 = smov 0   ;;  %s1745_s19 = smov 0  }
   0x6   :  { %s1747_s20 = smov 0   ;;  %s1749_s21 = smov 0  }
   0x7   :  { %s1751_s22 = smov 0   ;;  %s1753_s23 = smov 0  }
   0x8 LB: > { %2014 = sst [smem:[#allocation12_spill]] %s1628_s18  ;;  %s1276_s24 = sadd.s32 4294967295, %s1648_s23   ;;  %s1648_s23 = sphi %s1753_s23, %s30_s23   ;;  %s1644_s22 = sphi %s1751_s22, %s2032_s22   ;;  %s1640_s21 = sphi %s1749_s21, %s2031_s21   ;;  %s1636_s20 = sphi %s1747_s20, %s2030_s20   ;;  %s1632_s19 = sphi %s1745_s19, %s2034_s19   ;;  %s1628_s18 = sphi %s1743_s18, %s2033_s18  }
   0x9   : > { %2015 = sst [smem:[#allocation13_spill]] %s1636_s20  ;;  %s1277_s25 = sadd.s32 4294967294, %s1648_s23  }
   0xa   : > { %2016 = sst [smem:[#allocation14_spill]] %s1644_s22  ;;  %s42_s26 = sadd.s32 1, %s1644_s22 }
   0xb   : > { %2017 = sst [smem:[#allocation15_spill]] %s1648_s23  ;;  %s383_s27 = sadd.s32 1, %s1636_s20 }
   0xc   : > { %p44_p0 = scmp.ge.s32.totalorder %s42_s26, 2  ;;  %p393_p1 = scmp.ne.s32.totalorder %s1636_s20, %s1632_s19 }
   0xd   : > { %p394_p2 = scmp.eq.s32.totalorder %s1276_s24, 1  ;;  %p399_p3 = scmp.ne.s32.totalorder %s1632_s19, %s1628_s18 }
   0xe   : > { %s2036_s26 = smov (%p44_p0, %s42_s26), 0  ;;  %p400_p5 = scmp.eq.s32.totalorder %s1277_s25, 1 }
   0xf   : > { %2018 = sst [smem:[#allocation16_spill]] %s2036_s26  ;;  %p1783_p4 = por %p394_p2, %p393_p1 }
  0x10   : > { %s378_s29 = ssub.s32 %s1644_s22, %s2036_s26  ;;  %p1278_p6 = scmp.ge.s32.totalorder %s1648_s23, 1 }
  0x11   : > { %p381_p7 = scmp.eq.s32.totalorder %s378_s29, 0  ;;  %p1790_p8 = por %p400_p5, %p399_p3 }
  0x12   : > { %p407_p9 = scmp.lt.s32.totalorder %s1648_s23, 3  ;;  %p1802_p11 = scmp.eq.s32.totalorder %s1276_s24, 0 }
  0x13   : > { %s2020_s30 = scalar_select %p1790_p8, 1, 0 }
  0x14   : > { %s1796_s16 = scalar_select %p381_p7, %s1636_s20, %s383_s27  }
  0x15   : > { %2021 = sst [smem:[#allocation17_spill]] %s2020_s30  ;;  %p1798_p10 = pnand %p1278_p6, %p407_p9 }
  0x16   : > { %2022 = sst [smem:[#allocation18_spill]] %s1796_s16  ;;  %s421_s29 = sshll.u32 %s1992_s2, 4  ;;  %s422_s29 = int_to_ptr.hbm [resolvable:$true] %s421_s29 }
  0x17   : > { %p1394_p12 = pneg %p1798_p10  ;;  %s1650_s22 = smov [#allocation3]  }
  0x18   : > { %s423_s27 = sshll.u32 %s1650_s22, 4  ;;  %s456_s30 = sshll.u32 %s2001_s11, 4  ;;  %s424_s27 = int_to_ptr.vmem [resolvable:$true] %s423_s27  ;;  %s457_s30 = int_to_ptr.hbm [resolvable:$true] %s456_s30 }
  0x19   : > { %p1395_p13 = pnand %p1802_p11, %p1394_p12  ;;  %s1651_s24 = smov [#allocation6]  }
  0x1a   : > { %s458_s23 = sshll.u32 %s1651_s24, 4  ;;  %s1652_s26 = smov 64   ;;  %s459_s23 = int_to_ptr.vmem [resolvable:$true] %s458_s23 }
  0x1b   : > { %1397 = dma.hbm_to_vmem [thread:$0]  (!%p1395_p13), %s422_s29, 128, %s424_s27, [#allocation4]  }
  0x1c   : > { %s1653_s25 = smov 4   ;;  %500 = sbr.rel (%p1798_p10) target bundleno = 1656 (0x678), region = 80 }
  0x1d   : > { %1400 = dma.hbm_to_vmem [thread:$0]  (!%p1395_p13), %s457_s30, 256, %s459_s23, [#allocation7], %s1652_s26, %s1652_s26, %s1653_s25  }
  0x21   : > { %1615 = dma.done.wait (%p1802_p11), [#allocation4], 128  }
  0x22   : > { %1617 = vsyncadd (%p1802_p11), [#allocation4], 4294967168 }
  0x23   : > { %1619 = dma.done.wait (%p1802_p11), [#allocation7], 256  }
  0x24   : > { %1621 = vsyncadd (%p1802_p11), [#allocation7], 4294967040  ;;  %p560_p0 = scmp.lt.s32.totalorder %s1640_s21, 1  ;;  %s2025_s0 = sld [smem:[#allocation19_spill]]  ;;  %vm579_vm0 = vcmask 261120   ;;  %v1654_v6 = vmov 32.0  }
  0x25   : > { %1478 = vrcp.f32 %v1654_v6  ;;  %v1369_v10 = vld [vmem:[%s1994_s4 + $0x8] sm:$0xff]  ;;  %v1368_v12 = vld [vmem:[%s1994_s4] sm:$0xff]  ;;  %s1655_s18 = smov 112   ;;  %vm728_vm8 = vcmask 64512   ;;  %s1656_s25 = smov 120   ;;  %vm861_vm10 = vcmask 1043456  }
  0x26   : > { %s561_s20 = scalar_select %p560_p0, %s1640_s21, 1  ;;  %655 = vmatpush.bf16.msra.mxu1 %v1369_v10  ;;  %v1371_v15 = vld [vmem:[%s1996_s6 + $0x8] sm:$0xff]  ;;  %v1370_v18 = vld [vmem:[%s1996_s6] sm:$0xff]  ;;  %vm955_vm11 = vcmask 130112   ;;  %vm961_vm12 = vcmask 195712   ;;  %vm967_vm13 = vcmask 261312  }
  0x27   : > { %v1471_v31 = vld [vmem:[%s1993_s3] ss:$0 sm:$0xff]  ;;  %v574_v10 = vld [vmem:[#allocation3] sm:$0xff]  ;;  %s1660_s23 = smov 16   ;;  %s1661_s30 = smov 8  }
  0x28   : > { %s1286_s22 = sshll.u32 %s561_s20, 3  ;;  %v1472_v44 = vld [vmem:[%s1995_s5] ss:$0 sm:$0xff]  ;;  %s1657_s20 = smov 104   ;;  %vm575_vm9 = vcmp.eq.s32.totalorder %v574_v10, 0 }
  0x29   : > { %s570_s27 = scalar_lea.vmem %s1991_s1, %s1286_s22  ;;  %v1473_v49 = vld [vmem:[%s1997_s7] ss:$0 sm:$0xff]  ;;  %s1365_s24 = sshll.u32 %s1640_s21, 3 }
  0x2a   : > { %s566_s16 = scalar_lea.vmem %s2025_s0, %s1286_s22  ;;  %v573_v2 = vld [vmem:[%s570_s27] sm:$0xff]  ;;  %656 = vmatpush.bf16.msra.mxu1 %v1368_v12  ;;  %s1659_s22 = smov 96  }
  0x2b   : > { %v1834_v0 = vld [vmem:[%s566_s16] sm:$0xff]  ;;  %v607_v4 = vmul.f32 %v573_v2, %v573_v2  ;;  %v1479_v7 = vpop.eup %1478  ;;  %s1662_s16 = smov 24   ;;  %s557_s27 = sand.u32 1, %s1632_s19  }
  0x2c   : > { %v578_v1 = vmul.f32 %v1834_v0, %v1834_v0  ;;  %v584_v8 = vmul.f32 32.0, %v1479_v7  ;;  %vm588_vm1 = vweird.f32 %v1479_v7  ;;  %s1153_s21 = scalar_lea.sflag [#allocation5], %s557_s27 }
  0x2d   : > { %v608_v5 = vsel %vm579_vm0, %v607_v4, 0.0 }
  0x2e   : > { %v580_v3 = vsel %vm579_vm0, %v578_v1, 0.0  ;;  %v585_v9 = vsub.f32 1.0, %v584_v8  ;;  %692 = vmatpush.bf16.msrb.mxu1 %v1371_v15 }
  0x2f   : > { %581 = vadd.xlane.f32.xlu0 %v580_v3 }
  0x30   : > { %v586_v11 = vmul.f32 %v1479_v7, %v585_v9 }
  0x32   : > { %v587_v13 = vadd.f32 %v1479_v7, %v586_v11  ;;  %693 = vmatpush.bf16.msrb.mxu1 %v1370_v18  ;;  %v1658_v11 = vmov 0.0  }
  0x33   : > { %v576_v12 = vsel %vm575_vm9, -1e+09, %v1658_v11 }
  0x34   : > { %v1846_v14 = vsel %vm588_vm1, %v1479_v7, %v587_v13 }
  0x37   : > { %609 = vadd.xlane.f32.xlu0 %v608_v5 }
  0xa2   : > { %v582_v16 = vpop.xlane.xlu0 %581 }
  0xa3   : > { %v590_v17 = vmul.f32 %v1846_v14, %v582_v16 }
  0xa5   : > { %v591_v19 = vadd.f32 1e-06, %v590_v17 }
  0xa7   : > { %1480 = vrsqrt.f32 %v591_v19  ;;  %vm598_vm3 = vweird.f32 %v591_v19 }
  0xaa   : > { %v610_v20 = vpop.xlane.xlu0 %609 }
  0xab   : > { %v611_v21 = vmul.f32 %v610_v20, %v1846_v14 }
  0xad   : > { %v1481_v22 = vpop.eup %1480  ;;  %v612_v23 = vadd.f32 1e-06, %v611_v21 }
  0xae   : > { %v593_v24 = vmul.f32 %v1481_v22, %v591_v19  ;;  %vm599_vm2 = vweird.f32 %v1481_v22 }
  0xaf   : > { %1482 = vrsqrt.f32 %v612_v23  ;;  %vm600_vm4 = vmor %vm598_vm3, %vm599_vm2  ;;  %vm619_vm5 = vweird.f32 %v612_v23 }
  0xb0   : > { %v594_v25 = vmul.f32 %v1481_v22, %v593_v24 }
  0xb2   : > { %v595_v26 = vmul.f32 0.5, %v594_v25 }
  0xb4   : > { %v596_v27 = vsub.f32 1.5, %v595_v26 }
  0xb5   : > { %v1483_v28 = vpop.eup %1482 }
  0xb6   : > { %v597_v29 = vmul.f32 %v1481_v22, %v596_v27  ;;  %v614_v30 = vmul.f32 %v1483_v28, %v612_v23  ;;  %vm620_vm6 = vweird.f32 %v1483_v28 }
  0xb7   : > { %vm621_vm7 = vmor %vm619_vm5, %vm620_vm6 }
  0xb8   : > { %v615_v32 = vmul.f32 %v1483_v28, %v614_v30  ;;  %v601_v33 = vsel %vm600_vm4, %v1481_v22, %v597_v29 }
  0xb9   : > { %v602_v34 = vmul.f32 %v601_v33, %v1834_v0 }
  0xba   : > { %v616_v35 = vmul.f32 0.5, %v615_v32 }
  0xbb   : > { %v606_v36 = vmul.f32 %v1471_v31, %v602_v34 }
  0xbc   : > { %v617_v37 = vsub.f32 1.5, %v616_v35 }
  0xbd   : > { %v625_v38 = vpack.c.bf16 %v606_v36, %v606_v36 }
  0xbe   : > { %v618_v39 = vmul.f32 %v1483_v28, %v617_v37 }
  0xbf   : > { %1296 = vmatmul.msk.bf16.vlgmr.msra.gmra.mxu1 %vm579_vm0, %v625_v38 }
  0xc0   : > { %v622_v40 = vsel %vm621_vm7, %v1483_v28, %v618_v39 }
  0xc1   : > { %v623_v41 = vmul.f32 %v622_v40, %v573_v2 }
  0xc3   : > { %v624_v42 = vmul.f32 %v1471_v31, %v623_v41 }
  0xc5   : > { %v662_v43 = vpack.c.bf16 %v624_v42, %v624_v42 }
  0xcf   : > { %1305 = vmatmul.msk.bf16.vlgmr.msrb.gmra.mxu1 %vm579_vm0, %v662_v43 }
 0x13c   : > { %v658_v45 = vpop.f32.mrf.mxu1 }
 0x13d   : > { %v659_v46 = vadd.f32 %v1472_v44, %v658_v45 }
 0x13f   : > { %v699_v47 = vmul.f32 0.35355338, %v659_v46 }
 0x141   : > { %704 = vrot.lane.b32.xlu0 %v699_v47, %s1655_s18  ;;  %v710_v55 = vpack.c.bf16 %v699_v47, %v699_v47 }
 0x144   : > { %v660_v48 = vpop.f32.mrf.mxu1 }
 0x14c   : > { %v695_v50 = vpop.f32.mrf.mxu1 }
 0x14d   : > { %v696_v51 = vadd.f32 %v1473_v49, %v695_v50 }
 0x14f   : > { %718 = vrot.lane.b32.xlu2 %v696_v51, %s1655_s18  ;;  %715 = vrot.lane.b32.xlu1 %v696_v51, %s1656_s25  ;;  %v1868_v52 = vpack.c.bf16 %v696_v51, %v696_v51  ;;  %s1285_s18 = sshll.u32 %s557_s27, 3 }
 0x151   : > { %v733_v53 = vsel %vm728_vm8, %v1868_v52, 0  ;;  %v854_v42 = vunpack.c.l.b16 %v1868_v52 }
 0x152   : > { %742 = vmatpush.bf16.xpose.msra.mxu2 %v733_v53 }
 0x154   : > { %v697_v54 = vpop.f32.mrf.mxu1 }
 0x157   : > { %721 = vrot.lane.b32.xlu2 %v696_v51, %s1657_s20  ;;  %701 = vrot.lane.b32.xlu1 %v699_v47, %s1656_s25 }
 0x159   : > { %1306 = vmatmul.msk.bf16.vlgmr.msra.gmra.mxu2 %vm728_vm8, %v710_v55 }
 0x15f   : > { %707 = vrot.lane.b32.xlu1 %v699_v47, %s1657_s20  ;;  %v855_v47 = vpack.c.b16 %v854_v42, %v854_v42  ;;  %v1383_v42 = vld [vmem:[%s2003_s13 + $0x38] sm:$0xff] }
 0x1a9   : > { %v719_v56 = vpop.permute.xlu2 %718 }
 0x1aa   : > { %v726_v57 = vpack.c.bf16 %v719_v56, %v719_v56 }
 0x1ac   : > { %v771_v58 = vsel %vm728_vm8, %v726_v57, 0  ;;  %v903_v30 = vunpack.c.l.b16 %v726_v57 }
 0x1ad   : > { %780 = vmatpush.bf16.xpose.msra.mxu0 %v771_v58 }
 0x1ae   : > { %v904_v31 = vpack.c.b16 %v903_v30, %v903_v30 }
 0x1b1   : > { %v722_v59 = vpop.permute.xlu2 %721 }
 0x1b2   : > { %v1874_v60 = vpack.c.bf16 %v722_v59, %v722_v59 }
 0x1b3   : > { %v705_v61 = vpop.permute.xlu0 %704 }
 0x1b4   : > { %v790_v62 = vsel %vm728_vm8, %v1874_v60, 0  ;;  %v712_v63 = vpack.c.bf16 %v705_v61, %v705_v61  ;;  %v927_v58 = vunpack.c.l.b16 %v1874_v60 }
 0x1b5   : > { %799 = vmatpush.bf16.xpose.msra.mxu1 %v790_v62 }
 0x1b6   : > { %1308 = vmatmul.msk.bf16.vlgmr.msra.gmra.mxu0 %vm728_vm8, %v712_v63  ;;  %v928_v59 = vpack.c.b16 %v927_v58, %v927_v58 }
 0x1c1   : > { %v716_v1 = vpop.permute.xlu1 %715 }
 0x1c2   : > { %v725_v2 = vpack.c.bf16 %v716_v1, %v716_v1 }
 0x1c4   : > { %v752_v3 = vsel %vm728_vm8, %v725_v2, 0  ;;  %v879_v18 = vunpack.c.l.b16 %v725_v2 }
 0x1c5   : > { %761 = vmatpush.bf16.xpose.msra.mxu3 %v752_v3 }
 0x1c6   : > { %v880_v19 = vpack.c.b16 %v879_v18, %v879_v18 }
 0x1c9   : > { %v702_v4 = vpop.permute.xlu1 %701 }
 0x1ca   : > { %v711_v5 = vpack.c.bf16 %v702_v4, %v702_v4 }
 0x1cc   : > { %1307 = vmatmul.msk.bf16.vlgmr.msra.gmra.mxu3 %vm728_vm8, %v711_v5 }
 0x1d1   : > { %v708_v6 = vpop.permute.xlu1 %707 }
 0x1d2   : > { %v713_v7 = vpack.c.bf16 %v708_v6, %v708_v6 }
 0x1d4   : > { %1309 = vmatmul.msk.bf16.vlgmr.msra.gmra.mxu1 %vm728_vm8, %v713_v7 }
 0x1dc   : > { %v744_v8 = vpop.f32.mrf.mxu2 }
 0x1dd   : > { %v745_v26 = vadd.f32 %v744_v8, %v576_v12 }
 0x1df   : > { %v805_v29 = vsel %vm728_vm8, %v745_v26, -inf }
 0x1e4   : > { %v746_v9 = vpop.f32.mrf.mxu2 }
 0x233   : > { %v782_v13 = vpop.f32.mrf.mxu0 }
 0x234   : > { %v783_v15 = vadd.f32 %v782_v13, %v576_v12 }
 0x236   : > { %v811_v16 = vsel %vm728_vm8, %v783_v15, -inf }
 0x237   : > { %812 = vmax.xlane.f32.xlu1 %v811_v16 }
 0x23b   : > { %v784_v17 = vpop.f32.mrf.mxu0 }
 0x24f   : > { %v763_v20 = vpop.f32.mrf.mxu3 }
 0x250   : > { %v764_v21 = vadd.f32 %v763_v20, %v576_v12  ;;  %881 = vrot.lane.b32.xlu1 %v880_v19, %s1659_s22 }
 0x251   : > { %v801_v22 = vpop.f32.mrf.mxu1 }
 0x252   : > { %v802_v23 = vadd.f32 %v801_v22, %v576_v12  ;;  %v808_v24 = vsel %vm728_vm8, %v764_v21, -inf }
 0x253   : > { %809 = vmax.xlane.f32.xlu2 %v808_v24 }
 0x254   : > { %v814_v25 = vsel %vm728_vm8, %v802_v23, -inf }
 0x255   : > { %815 = vmax.xlane.f32.xlu0 %v814_v25 }
 0x257   : > { %v765_v27 = vpop.f32.mrf.mxu3 }
 0x258   : > { %v1372_v27 = vld [vmem:[%s1998_s8] sm:$0xff] }
 0x259   : > { %v803_v28 = vpop.f32.mrf.mxu1 }
 0x25b   : > { %806 = vmax.xlane.f32.xlu2 %v805_v29 }
 0x269   : > { %905 = vrot.lane.b32.xlu0 %v904_v31, %s1659_s22 }
 0x2aa   : > { %v813_v32 = vpop.xlane.xlu1 %812 }
 0x2ab   : > { %v819_v33 = vsub.f32 %v783_v15, %v813_v32 }
 0x2ad   : > { %v825_v34 = vmul.f32 1.442695, %v819_v33  ;;  %v1474_v33 = vld [vmem:[%s1999_s9] ss:$0 sm:$0xff] }
 0x2af   : > { %1484 = vpow2.f32 %v825_v34 }
 0x2b5   : > { %v1485_v35 = vpop.eup %1484 }
 0x2b6   : > { %v835_v36 = vsel %vm728_vm8, %v1485_v35, 0.0 }
 0x2b7   : > { %836 = vadd.xlane.f32.xlu1 %v835_v36 }
 0x2c2   : > { %v882_v37 = vpop.permute.xlu1 %881 }
 0x2c3   : > { %v887_v38 = vsel %vm861_vm10, %v882_v37, 0 }
 0x2c4   : > { %896 = vmatpush.bf16.msrb.mxu3 %v887_v38 }
 0x2c6   : > { %v810_v39 = vpop.xlane.xlu2 %809 }
 0x2c7   : > { %v818_v43 = vsub.f32 %v764_v21, %v810_v39 }
 0x2c8   : > { %v816_v40 = vpop.xlane.xlu0 %815 }
 0x2c9   : > { %v820_v41 = vsub.f32 %v802_v23, %v816_v40  ;;  %v823_v45 = vmul.f32 1.442695, %v818_v43  ;;  %v1375_v40 = vld [vmem:[#allocation6 + $0x8] sm:$0xff]  ;;  %v1382_v43 = vld [vmem:[%s2003_s13 + $0x30] sm:$0xff] }
 0x2ca   : > { %1060 = vmatpush.bf16.msra.mxu3 %v1375_v40 }
 0x2cb   : > { %v827_v44 = vmul.f32 1.442695, %v820_v41  ;;  %v1374_v41 = vld [vmem:[#allocation6] sm:$0xff] }
 0x2cd   : > { %1486 = vpow2.f32 %v827_v44 }
 0x2ce   : > { %v807_v46 = vpop.xlane.xlu2 %806  ;;  %1488 = vpow2.f32 %v823_v45  ;;  %1061 = vmatpush.bf16.msra.mxu3 %v1374_v41 }
 0x2cf   : > { %v817_v48 = vsub.f32 %v745_v26, %v807_v46  ;;  %v1373_v26 = vld [vmem:[%s1998_s8 + $0x8] sm:$0xff] }
 0x2d0   : > { %856 = vrot.lane.b32.xlu1 %v855_v47, %s1659_s22  ;;  %v1381_v46 = vld [vmem:[%s2003_s13 + $0x28] sm:$0xff]  ;;  %v1380_v47 = vld [vmem:[%s2003_s13 + $0x20] sm:$0xff] }
 0x2d1   : > { %v821_v49 = vmul.f32 1.442695, %v817_v48 }
 0x2d3   : > { %v1487_v50 = vpop.eup %1486  ;;  %1490 = vpow2.f32 %v821_v49  ;;  %v1379_v49 = vld [vmem:[%s2003_s13 + $0x18] sm:$0xff] }
 0x2d4   : > { %v838_v51 = vsel %vm728_vm8, %v1487_v50, 0.0  ;;  %v1489_v53 = vpop.eup %1488 }
 0x2d5   : > { %839 = vadd.xlane.f32.xlu2 %v838_v51  ;;  %v832_v56 = vsel %vm728_vm8, %v1489_v53, 0.0  ;;  %v1378_v51 = vld [vmem:[%s2003_s13 + $0x10] sm:$0xff] }
 0x2d9   : > { %v1491_v54 = vpop.eup %1490 }
 0x2da   : > { %v829_v52 = vsel %vm728_vm8, %v1491_v54, 0.0 }
 0x2db   : > { %830 = vadd.xlane.f32.xlu0 %v829_v52  ;;  %v906_v55 = vpop.permute.xlu0 %905 }
 0x2dc   : > { %v911_v57 = vsel %vm861_vm10, %v906_v55, 0  ;;  %v1475_v55 = vld [vmem:[%s2000_s10] ss:$0 sm:$0xff] }
 0x2dd   : > { %833 = vadd.xlane.f32.xlu2 %v832_v56  ;;  %920 = vmatpush.bf16.msrb.mxu0 %v911_v57 }
 0x2e1   : > { %1137 = vmatpush.bf16.msra.mxu0 %v1383_v42 }
 0x2e5   : > { %1138 = vmatpush.bf16.msra.mxu0 %v1382_v43 }
 0x2e9   : > { %1139 = vmatpush.bf16.msra.mxu0 %v1381_v46 }
 0x2ed   : > { %1140 = vmatpush.bf16.msra.mxu0 %v1380_v47 }
 0x2f1   : > { %1141 = vmatpush.bf16.msra.mxu0 %v1379_v49 }
 0x2f5   : > { %929 = vrot.lane.b32.xlu2 %v928_v59, %s1659_s22  ;;  %1142 = vmatpush.bf16.msra.mxu0 %v1378_v51 }
 0x32a   : > { %v837_v61 = vpop.xlane.xlu1 %836 }
 0x32b   : > { %1492 = vrcp.f32 %v837_v61  ;;  %v1377_v61 = vld [vmem:[%s2003_s13 + $0x8] sm:$0xff] }
 0x32c   : > { %1143 = vmatpush.bf16.msra.mxu0 %v1377_v61 }
 0x331   : > { %v1493_v62 = vpop.eup %1492 }
 0x332   : > { %v847_v63 = vmul.f32 %v1493_v62, %v1485_v35  ;;  %v1376_v62 = vld [vmem:[%s2003_s13] sm:$0xff] }
 0x333   : > { %1144 = vmatpush.bf16.msra.mxu0 %v1376_v62 }
 0x334   : > { %v851_v1 = vpack.c.bf16 %v847_v63, %v847_v63  ;;  %v1476_v63 = vld [vmem:[%s2002_s12] ss:$0 sm:$0xff] }
 0x336   : > { %1312 = vmatmul.msk.bf16.vlgmr.msrb.gmra.mxu0 %vm728_vm8, %v851_v1 }
 0x342   : > { %v857_v2 = vpop.permute.xlu1 %856 }
 0x343   : > { %v863_v3 = vsel %vm861_vm10, %v857_v2, 0 }
 0x344   : > { %872 = vmatpush.bf16.msrb.mxu2 %v863_v3 }
 0x348   : > { %v840_v4 = vpop.xlane.xlu2 %839  ;;  %1000 = vmatpush.bf16.msra.mxu2 %v1373_v26 }
 0x349   : > { %1494 = vrcp.f32 %v840_v4 }
 0x34c   : > { %1001 = vmatpush.bf16.msra.mxu2 %v1372_v27 }
 0x34e   : > { %v831_v5 = vpop.xlane.xlu0 %830 }
 0x34f   : > { %1496 = vrcp.f32 %v831_v5  ;;  %v1495_v60 = vpop.eup %1494 }
 0x350   : > { %v834_v6 = vpop.xlane.xlu2 %833  ;;  %v848_v10 = vmul.f32 %v1495_v60, %v1487_v50 }
 0x351   : > { %1498 = vrcp.f32 %v834_v6  ;;  %v1477_v6 = vld [vmem:[%s2004_s14] ss:$0 sm:$0xff] }
 0x352   : > { %v852_v17 = vpack.c.bf16 %v848_v10, %v848_v10 }
 0x355   : > { %v1497_v7 = vpop.eup %1496 }
 0x356   : > { %v845_v8 = vmul.f32 %v1497_v7, %v1491_v54 }
 0x357   : > { %v1499_v9 = vpop.eup %1498 }
 0x358   : > { %v849_v11 = vpack.c.bf16 %v845_v8, %v845_v8  ;;  %v846_v12 = vmul.f32 %v1499_v9, %v1489_v53  ;;  %v930_v13 = vpop.permute.xlu2 %929 }
 0x359   : > { %v935_v15 = vsel %vm861_vm10, %v930_v13, 0 }
 0x35a   : > { %1310 = vmatmul.msk.bf16.vlgmr.msrb.gmra.mxu2 %vm728_vm8, %v849_v11  ;;  %944 = vmatpush.bf16.msrb.mxu1 %v935_v15  ;;  %v850_v16 = vpack.c.bf16 %v846_v12, %v846_v12 }
 0x35c   : > { %1311 = vmatmul.msk.bf16.vlgmr.msrb.gmra.mxu3 %vm728_vm8, %v850_v16 }
 0x35d   : > { %1313 = vmatmul.msk.bf16.vlgmr.msrb.gmra.mxu1 %vm728_vm8, %v852_v17 }
 0x3b3   : > { %v922_v18 = vpop.f32.mrf.mxu0 }
 0x3b4   : > { %958 = vrot.lane.b32.xlu1 %v922_v18, %s1660_s23  ;;  %s1164_s23 = scalar_lea.hbm %s2005_s15, %s1365_s24 }
 0x3b5   : > { %s1168_s17 = sshll.u32 %s1164_s23, 4  ;;  %s1169_s17 = int_to_ptr.hbm [resolvable:$true] %s1168_s17 }
 0x3b6   : > { %s1576_s29 = sshra.s32 %s1169_s17, 4  ;;  %s1577_s29 = int_to_ptr.hbm [resolvable:$true] %s1576_s29 }
 0x3b7   : > { %s1578_s26 = scalar_lea.hbm %s1577_s29, 8  ;;  %p1583_p5 = scmp.lt.s32.totalorder %s1577_s29, %s2005_s15 }
 0x3b8   : > { %p1579_p1 = scmp.ne.s32.totalorder %s1577_s29, %s1578_s26 }
 0x3ba   : > { %p1580_p2 = pnand %p1579_p1, %p1783_p4 }
 0x3bb   : > { %v924_v19 = vpop.f32.mrf.mxu0 }
 0x3bc   : > { %p1581_p3 = pneg %p1580_p2 }
 0x3da   : > { %v946_v20 = vpop.f32.mrf.mxu1 }
 0x3dd   : > { %v874_v21 = vpop.f32.mrf.mxu2 }
 0x3de   : > { %950 = vst.msk [vmem:[#allocation2] sm:$0xff] %vm728_vm8, %v874_v21 }
 0x3df   : > { %v898_v22 = vpop.f32.mrf.mxu3 }
 0x3e0   : > { %952 = vrot.lane.b32.xlu2 %v898_v22, %s1661_s30  ;;  %s559_s30 = scalar_lea.vmem [#allocation8], %s1285_s18  ;;  %s1582_s18 = scalar_lea.hbm %s2005_s15, 16 }
 0x3e1   : > { %p1584_p6 = scmp.lt.s32.totalorder %s1582_s18, %s1578_s26 }
 0x3e2   : > { %v948_v23 = vpop.f32.mrf.mxu1 }
 0x3e3   : > { %p1585_p7 = por %p1584_p6, %p1583_p5 }
 0x3e5   : > { %v876_v24 = vpop.f32.mrf.mxu2  ;;  %p1586_p9 = pnand %p1585_p7, %p1581_p3 }
 0x3e7   : > { %v900_v25 = vpop.f32.mrf.mxu3 }
 0x3e8   : > { %964 = vrot.lane.b32.xlu2 %v946_v20, %s1662_s16  ;;  %s1166_s16 = sshll.u32 %s559_s30, 4  ;;  %s1167_s16 = int_to_ptr.vmem [resolvable:$true] %s1166_s16 }
 0x426   : > { %v959_v29 = vpop.permute.xlu1 %958 }
 0x43a   : > { %v953_v28 = vpop.permute.xlu2 %952 }
 0x43b   : > { %956 = vst.msk [vmem:[#allocation2] sm:$0xff] %vm955_vm11, %v953_v28 }
 0x43c   : > { %962 = vst.msk [vmem:[#allocation2] sm:$0xff] %vm961_vm12, %v959_v29 }
 0x442   : > { %v965_v30 = vpop.permute.xlu2 %964 }
 0x443   : > { %968 = vst.msk [vmem:[#allocation2] sm:$0xff] %vm967_vm13, %v965_v30 }
 0x44a   : > { %v969_v31 = vld [vmem:[#allocation2] sm:$0xff] }
 0x44b   : > { %v970_v32 = vpack.c.bf16 %v969_v31, %v969_v31 }
 0x44d   : > { %1322 = vmatmul.msk.bf16.vlgmr.msra.gmra.mxu2 %vm579_vm0, %v970_v32 }
 0x4d0   : > { %v1003_v34 = vpop.f32.mrf.mxu2 }
 0x4d1   : > { %v1004_v35 = vadd.f32 %v1474_v33, %v1003_v34 }
 0x4d3   : > { %v1007_v36 = vadd.f32 %v1004_v35, %v1834_v0 }
 0x4d5   : > { %v1009_v37 = vmul.f32 %v1007_v36, %v1007_v36 }
 0x4d7   : > { %v1010_v38 = vsel %vm579_vm0, %v1009_v37, 0.0 }
 0x4d8   : > { %v1005_v39 = vpop.f32.mrf.mxu2  ;;  %1011 = vadd.xlane.f32.xlu1 %v1010_v38 }
 0x54b   : > { %v1012_v44 = vpop.xlane.xlu1 %1011 }
 0x54c   : > { %v1013_v0 = vmul.f32 %v1012_v44, %v1846_v14 }
 0x54e   : > { %v1014_v45 = vadd.f32 1e-06, %v1013_v0 }
 0x550   : > { %1500 = vrsqrt.f32 %v1014_v45  ;;  %vm1021_vm15 = vweird.f32 %v1014_v45 }
 0x556   : > { %v1501_v48 = vpop.eup %1500 }
 0x557   : > { %v1016_v50 = vmul.f32 %v1501_v48, %v1014_v45  ;;  %vm1022_vm14 = vweird.f32 %v1501_v48 }
 0x558   : > { %vm1023_vm1 = vmor %vm1021_vm15, %vm1022_vm14 }
 0x559   : > { %v1017_v14 = vmul.f32 %v1501_v48, %v1016_v50 }
 0x55b   : > { %v1018_v53 = vmul.f32 0.5, %v1017_v14 }
 0x55d   : > { %v1019_v54 = vsub.f32 1.5, %v1018_v53 }
 0x55f   : > { %v1020_v52 = vmul.f32 %v1501_v48, %v1019_v54 }
 0x561   : > { %v1024_v56 = vsel %vm1023_vm1, %v1501_v48, %v1020_v52 }
 0x562   : > { %v1025_v57 = vmul.f32 %v1024_v56, %v1007_v36 }
 0x564   : > { %v1029_v58 = vmul.f32 %v1475_v55, %v1025_v57 }
 0x566   : > { %v1030_v59 = vpack.c.bf16 %v1029_v58, %v1029_v58 }
 0x568   : > { %1331 = vmatmul.msk.bf16.vlgmr.msra.gmra.mxu3 %vm579_vm0, %v1030_v59 }
 0x5eb   : > { %v1063_v1 = vpop.f32.mrf.mxu3 }
 0x5ec   : > { %v1064_v2 = vadd.f32 %v1476_v63, %v1063_v1 }
 0x5ee   : > { %v1067_v3 = vmax.f32 %v1064_v2, 0.0 }
 0x5f0   : > { %v1068_v4 = vpack.c.bf16 %v1067_v3, %v1067_v3 }
 0x5f2   : > { %1145 = vmatmul.bf16.vlgmr.msra.gmra.mxu0 %v1068_v4 }
 0x5f3   : > { %v1065_v5 = vpop.f32.mrf.mxu3 }
 0x66f   : > { %v1146_v60 = vpop.f32.mrf.mxu0 }
 0x670   : > { %v1147_v7 = vadd.f32 %v1477_v6, %v1146_v60 }
 0x672   : > { %v1150_v8 = vadd.f32 %v1147_v7, %v1007_v36 }
 0x674   : > { %1151 = vst.msk [vmem:[%s559_s30] sm:$0xff] %vm579_vm0, %v1150_v8 }
 0x675   : > { %1589 = shalt.err (!%p1586_p9)
}
 0x676   : > { %1392 = dma.vmem_to_hbm [thread:$0]  (%p1783_p4), %s1167_s16, 128, %s1169_s17, %s1153_s21  }
 0x677   : > { %v1148_v9 = vpop.f32.mrf.mxu0 }
 0x678 PF: > { %s2026_s27 = sld [smem:[#allocation15_spill]] }
 0x679   : > { %s2027_s23 = sld [smem:[#allocation12_spill]] }
 0x67e   : > { %p1409_p10 = scmp.ge.s32.totalorder %s2026_s27, 2 }
 0x67f   : > { %s1180_s0 = sand.u32 1, %s2027_s23  }
 0x680   : > { %p1402_p11 = pnand %p1409_p10, %p1790_p8  ;;  %s1181_s25 = scalar_lea.sflag [#allocation5], %s1180_s0 }
 0x682   : > { %p1403_p12 = pneg %p1402_p11 }
 0x684   : > { %1623 = dma.done.wait (%p1403_p12), %s1181_s25, 128  }
 0x685   : > { %1625 = vsyncadd (%p1403_p12), %s1181_s25, 4294967168  ;;  %s30_s23 = sadd.s32 1, %s2026_s27   ;;  %s2029_s29 = sld [smem:[#allocation13_spill]] }
 0x686   : > { %p27_p13 = scmp.ge.s32.totalorder %s30_s23, 4   ;;  %s2030_s20 = sld [smem:[#allocation18_spill]] }
 0x687   : > { %s2031_s21 = sld [smem:[#allocation14_spill]]  ;;  %s2033_s18 = smov %s1632_s19 }
 0x688   : > { %s2032_s22 = sld [smem:[#allocation16_spill]]  ;;  %29 = sbr.rel (!%p27_p13) target bundleno = 8 (0x8), region = 128 }
 0x68b   : > { %s2034_s19 = smov %s2029_s29 }
 0x68d   :  { %1187 = vsyncpa [#allocation4], 1 }
 0x68e   :  { %1189 = vsyncpa [#allocation4 + $0x1], 1 }
 0x68f   :  { %1190 = vsyncpa [#allocation7], 1 }
 0x690   :  { %1191 = vsyncpa [#allocation5], 1 }
 0x691   :  { %1193 = vsyncpa [#allocation5 + $0x1], 1 }

</bundles_post_ra>
